<compile_context>
chip_gen: v5e
topology: v5e:2x2
jax: 0.10.0
libtpu: 0.0.40
codegen_flags: <defaults>
</compile_context>

<pallas_src>
import functools

import jax
import jax.numpy as jnp
from jax.experimental import pallas as pl
from jax.experimental.pallas import tpu as pltpu

_IN_FEATURES = 4
_OUT_FEATURES = 8


def _round_up(n, m):
    return ((n + m - 1) // m) * m


def _linear_sigmoid_t(xt, w, b):
    """xt: (4, n) batch-on-lanes; w: (8, 4) torch layout; b: (8, 1).

    Returns sigmoid(W @ x + b) with shape (8, n).  The K=4 contraction is
    unrolled into 4 broadcast multiply-adds on the VPU over fully lane-dense
    vregs; the sigmoid uses a single EUP tanh.
    """
    z = b + w[:, 0:1] * xt[0:1, :]
    z = z + w[:, 1:2] * xt[1:2, :]
    z = z + w[:, 2:3] * xt[2:3, :]
    z = z + w[:, 3:4] * xt[3:4, :]
    return 0.5 * (1.0 + jnp.tanh(0.5 * z))  # == sigmoid(z)


# ---------------------------------------------------------------------------
# Small/medium-batch fast path: one launch, whole problem in VMEM, x read once.
# ---------------------------------------------------------------------------
def _fused_kernel(eth_ref, x_ref, w_ref, b_ref, o_ref):
    c = _linear_sigmoid_t(x_ref[...], w_ref[...], b_ref[...])     # (8, B)
    # if min(c) < eth: c += eth - min(c)   <=>   c + max(eth - min(c), 0)
    shift = jnp.maximum(eth_ref[0] - jnp.min(c), jnp.float32(0.0))
    o_ref[...] = c + shift


# ---------------------------------------------------------------------------
# Large-batch path: single pallas_call, two streaming passes over x.
#   p == 0 : accumulate global min of sigmoid(linear(x)) in VMEM scratch
#   p == 1 : recompute activations and apply the uniform shift
# ---------------------------------------------------------------------------
def _two_pass_kernel(eth_ref, x_ref, w_ref, b_ref, o_ref, min_ref):
    p = pl.program_id(0)   # pass index
    i = pl.program_id(1)   # batch-tile index

    c = _linear_sigmoid_t(x_ref[...], w_ref[...], b_ref[...])     # (8, tm)

    @pl.when(jnp.logical_and(p == 0, i == 0))
    def _init():
        min_ref[...] = jnp.full((1, 1), jnp.inf, dtype=jnp.float32)

    @pl.when(p == 0)
    def _min_pass():
        # Padded columns are edge-replicated real samples, so no mask needed.
        min_ref[...] = jnp.minimum(min_ref[...], jnp.min(c))

    @pl.when(p == 1)
    def _shift_pass():
        shift = jnp.maximum(eth_ref[0] - min_ref[0, 0], jnp.float32(0.0))
        o_ref[...] = c + shift


# ---------------------------------------------------------------------------
# Wrapper.  jit folds the layout plumbing (transposes, padding, reshapes)
# into the compiled graph.
# ---------------------------------------------------------------------------
@functools.partial(jax.jit, static_argnames=("block_cols", "fused_max_cols"))
def conscious_forward(x, weight, bias, ethical_constraint, *,
                      block_cols=65536, fused_max_cols=131072):
    """x: [B, 4]; weight: [8, 4] (torch nn.Linear layout); bias: [8];
    ethical_constraint: scalar or [1].  Returns [B, 8] float32."""
    x = jnp.asarray(x, jnp.float32)
    B = x.shape[0]
    w = jnp.asarray(weight, jnp.float32).reshape(_OUT_FEATURES, _IN_FEATURES)
    b = jnp.asarray(bias, jnp.float32).reshape(_OUT_FEATURES, 1)
    eth = jnp.asarray(ethical_constraint, jnp.float32).reshape(1)

    xt = x.T                                   # (4, B): batch on the lane axis
    vmem_limit = 32 * 1024 * 1024              # safe on v5e/v6e/v7x

    if B <= fused_max_cols:
        out_t = pl.pallas_call(
            _fused_kernel,
            out_shape=jax.ShapeDtypeStruct((_OUT_FEATURES, B), jnp.float32),
            in_specs=[
                pl.BlockSpec(memory_space=pltpu.MemorySpace.SMEM),  # eth
                pl.BlockSpec(memory_space=pltpu.MemorySpace.VMEM),  # x^T
                pl.BlockSpec(memory_space=pltpu.MemorySpace.VMEM),  # W
                pl.BlockSpec(memory_space=pltpu.MemorySpace.VMEM),  # bias col
            ],
            out_specs=pl.BlockSpec(memory_space=pltpu.MemorySpace.VMEM),
            compiler_params=pltpu.CompilerParams(vmem_limit_bytes=vmem_limit),
            cost_estimate=pl.CostEstimate(
                flops=80 * B, transcendentals=8 * B,
                bytes_accessed=48 * B + 164),
        )(eth, xt, w, b)
        return out_t.T

    # ---- tiled fused two-pass path ------------------------------------------
    # Balance tiles: use the smallest tile (multiple of 128 lanes) that keeps
    # the same number of grid steps as the requested block_cols cap.
    nt = -(-B // block_cols)
    tm = _round_up(-(-B // nt), 128)
    bp = _round_up(B, tm)
    nt = bp // tm
    # Edge-pad: replicated real columns cannot change the global min, so the
    # kernel needs no padding mask at all.
    xt_p = xt if bp == B else jnp.pad(xt, ((0, 0), (0, bp - B)), mode="edge")

    x_spec = pl.BlockSpec((_IN_FEATURES, tm), lambda p, i: (0, i))
    w_spec = pl.BlockSpec((_OUT_FEATURES, _IN_FEATURES), lambda p, i: (0, 0))
    b_spec = pl.BlockSpec((_OUT_FEATURES, 1), lambda p, i: (0, 0))
    # During pass 0 the output block index is pinned to 0 -> the buffer stays
    # resident and is never flushed; pass 1 writes every block exactly once.
    o_spec = pl.BlockSpec((_OUT_FEATURES, tm), lambda p, i: (0, i * p))

    out_t = pl.pallas_call(
        _two_pass_kernel,
        out_shape=jax.ShapeDtypeStruct((_OUT_FEATURES, bp), jnp.float32),
        grid=(2, nt),
        in_specs=[
            pl.BlockSpec(memory_space=pltpu.MemorySpace.SMEM),      # eth
            x_spec, w_spec, b_spec,
        ],
        out_specs=o_spec,
        scratch_shapes=[pltpu.VMEM((1, 1), jnp.float32)],           # global min
        compiler_params=pltpu.CompilerParams(
            dimension_semantics=("arbitrary", "arbitrary"),
            vmem_limit_bytes=vmem_limit),
        cost_estimate=pl.CostEstimate(
            flops=152 * bp, transcendentals=16 * bp,
            bytes_accessed=64 * bp + 200),
    )(eth, xt_p, w, b)

    out_t = out_t[:, :B] if bp != B else out_t
    return out_t.T


def _reference(x, weight, bias, eth):
    c = jax.nn.sigmoid(x @ weight.T + bias)
    m = jnp.min(c)
    return jnp.where(m < eth, c + (eth - m), c)


if __name__ == "__main__":
    key = jax.random.PRNGKey(0)
    k_x, k_w, k_b, k_x2 = jax.random.split(key, 4)

    # PyTorch nn.Linear default init is U(-1/sqrt(4), 1/sqrt(4)).
    bound = 1.0 / jnp.sqrt(4.0)
    weight = jax.random.uniform(k_w, (8, 4), jnp.float32, -bound, bound)
    bias = jax.random.uniform(k_b, (8,), jnp.float32, -bound, bound)
    ethical_constraint = jnp.float32(0.92)

    # Small batch -> single fused launch.
    x_small = jax.random.normal(k_x, (8, 4), dtype=jnp.float32)
    out_small = conscious_forward(x_small, weight, bias, ethical_constraint)
    jax.block_until_ready(out_small)
    ref_small = _reference(x_small, weight, bias, ethical_constraint)
    assert out_small.shape == (8, 8)
    assert jnp.allclose(out_small, ref_small, atol=1e-5, rtol=1e-5)

    # Larger, non-tile-aligned batch -> fused two-pass grid path
    # (small overrides just to exercise the tiled path at test size).
    x_big = jax.random.normal(k_x2, (1000, 4), dtype=jnp.float32)
    out_big = conscious_forward(x_big, weight, bias, ethical_constraint,
                                block_cols=256, fused_max_cols=128)
    jax.block_until_ready(out_big)
    ref_big = _reference(x_big, weight, bias, ethical_constraint)
    assert out_big.shape == (1000, 8)
    assert jnp.allclose(out_big, ref_big, atol=1e-5, rtol=1e-5)

    print("KERNEL_OK")
</pallas_src>

<mosaic_0001>
module attributes {stable_mosaic.version = 11 : i64} {
  func.func @_fused_kernel(%arg0: memref<1xf32, #tpu.memory_space<smem>>, %arg1: memref<4x8xf32, #tpu.memory_space<vmem>>, %arg2: memref<8x4xf32, #tpu.memory_space<vmem>>, %arg3: memref<8x1xf32, #tpu.memory_space<vmem>>, %arg4: memref<8x8xf32, #tpu.memory_space<vmem>>) attributes {dimension_semantics = [], scalar_prefetch = 0 : i64, scratch_operands = 0 : i64, tpu.core_type = #tpu.core_type<tc>} {
    %c0 = arith.constant 0 : index
    %c0_0 = arith.constant 0 : index
    %0 = vector.load %arg1[%c0, %c0_0] : memref<4x8xf32, #tpu.memory_space<vmem>>, vector<4x8xf32>
    %c0_1 = arith.constant 0 : index
    %c0_2 = arith.constant 0 : index
    %1 = vector.load %arg2[%c0_1, %c0_2] : memref<8x4xf32, #tpu.memory_space<vmem>>, vector<8x4xf32>
    %c0_3 = arith.constant 0 : index
    %c0_4 = arith.constant 0 : index
    %2 = vector.load %arg3[%c0_3, %c0_4] : memref<8x1xf32, #tpu.memory_space<vmem>>, vector<8x1xf32>
    %3 = vector.extract_strided_slice %1 {offsets = [0, 0], sizes = [8, 1], strides = [1, 1]} : vector<8x4xf32> to vector<8x1xf32>
    %4 = vector.extract_strided_slice %0 {offsets = [0, 0], sizes = [1, 8], strides = [1, 1]} : vector<4x8xf32> to vector<1x8xf32>
    %5 = vector.broadcast %3 : vector<8x1xf32> to vector<8x8xf32>
    %6 = vector.broadcast %4 : vector<1x8xf32> to vector<8x8xf32>
    %7 = arith.mulf %5, %6 : vector<8x8xf32>
    %8 = vector.broadcast %2 : vector<8x1xf32> to vector<8x8xf32>
    %9 = arith.addf %8, %7 : vector<8x8xf32>
    %10 = vector.extract_strided_slice %1 {offsets = [0, 1], sizes = [8, 1], strides = [1, 1]} : vector<8x4xf32> to vector<8x1xf32>
    %11 = vector.extract_strided_slice %0 {offsets = [1, 0], sizes = [1, 8], strides = [1, 1]} : vector<4x8xf32> to vector<1x8xf32>
    %12 = vector.broadcast %10 : vector<8x1xf32> to vector<8x8xf32>
    %13 = vector.broadcast %11 : vector<1x8xf32> to vector<8x8xf32>
    %14 = arith.mulf %12, %13 : vector<8x8xf32>
    %15 = arith.addf %9, %14 : vector<8x8xf32>
    %16 = vector.extract_strided_slice %1 {offsets = [0, 2], sizes = [8, 1], strides = [1, 1]} : vector<8x4xf32> to vector<8x1xf32>
    %17 = vector.extract_strided_slice %0 {offsets = [2, 0], sizes = [1, 8], strides = [1, 1]} : vector<4x8xf32> to vector<1x8xf32>
    %18 = vector.broadcast %16 : vector<8x1xf32> to vector<8x8xf32>
    %19 = vector.broadcast %17 : vector<1x8xf32> to vector<8x8xf32>
    %20 = arith.mulf %18, %19 : vector<8x8xf32>
    %21 = arith.addf %15, %20 : vector<8x8xf32>
    %22 = vector.extract_strided_slice %1 {offsets = [0, 3], sizes = [8, 1], strides = [1, 1]} : vector<8x4xf32> to vector<8x1xf32>
    %23 = vector.extract_strided_slice %0 {offsets = [3, 0], sizes = [1, 8], strides = [1, 1]} : vector<4x8xf32> to vector<1x8xf32>
    %24 = vector.broadcast %22 : vector<8x1xf32> to vector<8x8xf32>
    %25 = vector.broadcast %23 : vector<1x8xf32> to vector<8x8xf32>
    %26 = arith.mulf %24, %25 : vector<8x8xf32>
    %27 = arith.addf %21, %26 : vector<8x8xf32>
    %cst = arith.constant 5.000000e-01 : f32
    %28 = vector.broadcast %cst : f32 to vector<8x8xf32>
    %29 = arith.mulf %28, %27 : vector<8x8xf32>
    %30 = math.tanh %29 : vector<8x8xf32>
    %cst_5 = arith.constant 1.000000e+00 : f32
    %31 = vector.broadcast %cst_5 : f32 to vector<8x8xf32>
    %32 = arith.addf %31, %30 : vector<8x8xf32>
    %cst_6 = arith.constant 5.000000e-01 : f32
    %33 = vector.broadcast %cst_6 : f32 to vector<8x8xf32>
    %34 = arith.mulf %33, %32 : vector<8x8xf32>
    %c0_7 = arith.constant 0 : index
    %35 = memref.load %arg0[%c0_7] : memref<1xf32, #tpu.memory_space<smem>>
    %36 = vector.shape_cast %34 : vector<8x8xf32> to vector<1x8x8xf32>
    %cst_8 = arith.constant dense<0x7F800000> : vector<1xf32>
    %37 = vector.multi_reduction <minimumf>, %36, %cst_8 [1, 2] : vector<1x8x8xf32> to vector<1xf32>
    %38 = vector.shape_cast %37 : vector<1xf32> to vector<1x1x1xf32>
    %39 = vector.extract %38[0, 0, 0] : f32 from vector<1x1x1xf32>
    %40 = arith.subf %35, %39 : f32
    %cst_9 = arith.constant 0.000000e+00 : f32
    %41 = arith.maximumf %40, %cst_9 : f32
    %42 = vector.broadcast %41 : f32 to vector<8x8xf32>
    %43 = arith.addf %34, %42 : vector<8x8xf32>
    %c0_10 = arith.constant 0 : index
    %c0_11 = arith.constant 0 : index
    %44 = vector.load %arg4[%c0_10, %c0_11] : memref<8x8xf32, #tpu.memory_space<vmem>>, vector<8x8xf32>
    tpu.vector_store %arg4[%c0_10, %c0_11], %43 {strides = array<i32>} : memref<8x8xf32, #tpu.memory_space<vmem>>, vector<8x8xf32>,
    return
  }
}

</mosaic_0001>

<bundles_post_ra>
// kernel: conscious_forward.1
= control target key start
LH: loop header
LB: loop body
LE: loop exit
PB: predicated region body
PF: predicated region fallthrough
CT: control target
= control target key end

     0   :  { %v94_v0 = vmov 0   ;;  %v95_v1 = vmov 1   ;;  %v96_v3 = vmov 3   ;;  %v97_v5 = vmov 2   ;;  %s98_s22 = smov 0.0   ;;  %s141_s2 = inlined_call_operand.vmem [shape: f32[8,4], index: 2, kind: input, shape index: {}]   ;;  %s142_s3 = inlined_call_operand.vmem [shape: f32[8,1], index: 3, kind: input, shape index: {}]   ;;  %s143_s1 = inlined_call_operand.vmem [shape: f32[4,8], index: 1, kind: input, shape index: {}]   ;;  %s144_s0 = inlined_call_operand.<no memory space> [shape: f32[1], index: 0, kind: input, shape index: {}]   ;;  %s145_s4 = inlined_call_operand.vmem [shape: f32[8,8], index: 4, kind: output, shape index: {}]  }
   0x1   :  { %87 = vset.pattern.permute.xlu0 %v94_v0  ;;  %88 = vset.pattern.permute.xlu1 %v95_v1  ;;  %v19_v2 = vld [vmem:[%s141_s2] sm:$0xff]  ;;  %vm60_vm0 = vcmask 64512  }
   0x2   :  { %23 = vperm.xlu0 %87, %v19_v2   ;;  %35 = vperm.xlu1 %88, %v19_v2   ;;  %v20_v4 = vld [vmem:[%s142_s3] sm:$0xff] }
   0x3   :  { %90 = vset.pattern.permute.xlu2 %v96_v3  ;;  %v18_v7 = vld [vmem:[%s143_s1] sm:$0xf] }
   0x4   :  { %49 = vperm.xlu2 %90, %v19_v2   ;;  %v26_v9 = vperm.slane %v18_v7, 0  ;;  %v38_v10 = vperm.slane %v18_v7, 1  ;;  %v45_v11 = vperm.slane %v18_v7, 2  ;;  %v52_v13 = vperm.slane %v18_v7, 3 }
   0xa   :  { %30 = vperm.xlu0 %87, %v20_v4   ;;  %89 = vset.pattern.permute.xlu1 %v97_v5 }
   0xb   :  { %42 = vperm.xlu1 %89, %v19_v2  }
  0x12   :  { %91 = vset.pattern.permute.xlu0 %v96_v3 }
  0x5e   :  { %v50_v15 = vpop.permute.xlu2 %49 }
  0x5f   :  { %v53_v21 = vmul.f32 %v52_v13, %v50_v15 }
  0x74   :  { %v24_v6 = vpop.permute.xlu0 %23  ;;  %v36_v8 = vpop.permute.xlu1 %35 }
  0x75   :  { %v27_v12 = vmul.f32 %v26_v9, %v24_v6  ;;  %v39_v16 = vmul.f32 %v38_v10, %v36_v8 }
  0x7c   :  { %v31_v14 = vpop.permute.xlu0 %30 }
  0x7d   :  { %v33_v17 = vadd.f32 %v31_v14, %v27_v12  ;;  %v43_v18 = vpop.permute.xlu1 %42 }
  0x7e   :  { %v46_v19 = vmul.f32 %v45_v11, %v43_v18 }
  0x7f   :  { %v40_v20 = vadd.f32 %v39_v16, %v33_v17 }
  0x81   :  { %v47_v22 = vadd.f32 %v46_v19, %v40_v20 }
  0x83   :  { %v54_v23 = vadd.f32 %v53_v21, %v47_v22 }
  0x85   :  { %v55_v24 = vmul.f32 0.5, %v54_v23 }
  0x87   :  { %92 = vtanh.f32 %v55_v24 }
  0x8d   :  { %v93_v25 = vpop.eup %92 }
  0x8e   :  { %v57_v26 = vadd.f32 1.0, %v93_v25 }
  0x90   :  { %v58_v27 = vmul.f32 0.5, %v57_v26 }
  0x92   :  { %v61_v28 = vsel %vm60_vm0, %v58_v27, inf }
  0x93   :  { %62 = vmin.xlane.f32.xlu2 %v61_v28 }
 0x106   :  { %v63_v29 = vpop.xlane.xlu2 %62 }
 0x107   :  { %v64_v30 = vrot.slane %v63_v29, 4 }
 0x109   :  { %v65_v31 = vmin.f32 %v63_v29, %v64_v30 }
 0x10b   :  { %v66_v32 = vrot.slane %v65_v31, 2 }
 0x10d   :  { %v67_v33 = vmin.f32 %v65_v31, %v66_v32 }
 0x10f   :  { %v68_v34 = vrot.slane %v67_v33, 1 }
 0x111   :  { %v69_v35 = vmin.f32 %v67_v33, %v68_v34 }
 0x113   :  { %80 = vpush %v69_v35 }
 0x144   :  { %s81_s1 = spop %80 }
 0x145   :  { %s71_s21 = ssub.f32 %s144_s0, %s81_s1 }
 0x147   :  { %s72_s23 = smax.f32 %s98_s22, %s71_s21 }
 0x148   :  { %v73_v36 = vstv %s72_s23 }
 0x149   :  { %v74_v37 = vadd.f32 %v73_v36, %v58_v27 }
 0x14b   :  { %75 = vst.msk [vmem:[%s145_s4] sm:$0xff] %vm60_vm0, %v74_v37 }

</bundles_post_ra>
